<compile_context>
chip_gen: v5e
topology: v5e:2x2
jax: 0.10.0
libtpu: 0.0.40
codegen_flags: <defaults>
</compile_context>

<pallas_src>
import jax
import jax.numpy as jnp
from jax import lax
from jax.experimental import pallas as pl
from jax.experimental.pallas import tpu as pltpu


def _reverse_lstm_kernel(emb_ref, wih_ref, bias_ref, whh_ref, out_ref,
                         h_scr, hb_scr, c_scr):
    """One time-chunk of the reverse-direction LSTM recurrence.

    emb_ref : [CT, B, E] bf16 -- embeddings for this (reverse-order) chunk
    wih_ref : [E, 4H]    bf16 -- input weights, pre-transposed
    bias_ref: [1, 4H]    f32  -- b_ih + b_hh
    whh_ref : [H, 4H]    bf16 -- recurrent weights, pre-transposed
    out_ref : [B, H]     f32  -- final hidden state (written on last chunk)
    h_scr/hb_scr/c_scr   -- f32/bf16/f32 [B, H] carries across grid steps
    """
    CT, B, E = emb_ref.shape
    H, G = whh_ref.shape  # G == 4H

    # Initialize carries on the first grid step (chronologically-last chunk).
    @pl.when(pl.program_id(0) == 0)
    def _():
        h_scr[...] = jnp.zeros_like(h_scr)
        hb_scr[...] = jnp.zeros_like(hb_scr)
        c_scr[...] = jnp.zeros_like(c_scr)

    # Hoisted per-chunk constants (never inside the timestep loop).
    lane = lax.broadcasted_iota(jnp.int32, (B, G), 1)
    g_mask = (lane >= 2 * H) & (lane < 3 * H)           # g-gate lanes (i,f,g,o order)
    g_scale = jnp.where(g_mask, 2.0, 1.0).astype(jnp.float32)
    g_shift = jnp.where(g_mask, -1.0, 0.0).astype(jnp.float32)
    bias_b = jnp.broadcast_to(bias_ref[...], (B, G)).astype(jnp.float32)
    wih = wih_ref[...]                                   # [E, G] bf16
    whh = whh_ref[...]                                   # [H, G] bf16

    def step(t, carry):
        h_f32, h_bf, c = carry                           # [B,H] f32 / bf16 / f32
        lt = CT - 1 - t                                  # reverse time inside chunk

        # Input projection: independent of h/c -> off the serial chain, the
        # scheduler overlaps it with the previous step's recurrence.
        x_t = emb_ref[lt]                                # [B, E] bf16
        gin = jnp.dot(x_t, wih, preferred_element_type=jnp.float32) + bias_b

        # Recurrent projection: the only matmul on the serial path.  h is
        # already bf16 (cast done at the end of the previous step).
        rec = jnp.dot(h_bf, whh, preferred_element_type=jnp.float32)

        gates = gin + rec                                # [B, G] f32
        # Single EUP pass: sigmoid over the whole vreg; tanh on the g lanes
        # recovered as 2*sigmoid(2x)-1 with two cheap VPU ops.
        s = jax.nn.sigmoid(gates * g_scale)
        act = s * g_scale + g_shift

        i_g = act[:, 0 * H:1 * H]
        f_g = act[:, 1 * H:2 * H]
        g_g = act[:, 2 * H:3 * H]
        o_g = act[:, 3 * H:4 * H]

        c_new = f_g * c + i_g * g_g
        h_new = o_g * jnp.tanh(c_new)                    # f32
        return h_new, h_new.astype(whh.dtype), c_new     # bf16 copy for next MXU

    init = (h_scr[...], hb_scr[...], c_scr[...])
    # Unroll bounded by the chunk length (not full T).
    h_f, h_b, c_f = lax.fori_loop(0, CT, step, init, unroll=True)

    h_scr[...] = h_f
    hb_scr[...] = h_b
    c_scr[...] = c_f

    @pl.when(pl.program_id(0) == pl.num_programs(0) - 1)
    def _():
        out_ref[...] = h_f


def reverse_lstm_last_hidden(emb_tbe, w_ih, w_hh, b_ih, b_hh, *, chunk_t=4):
    """Final hidden state of the reverse-direction LSTM.

    emb_tbe: [T, B, E] (bf16 recommended); w_ih: [4H, E]; w_hh: [4H, H];
    b_ih, b_hh: [4H].  Returns [B, H] f32 (== PyTorch last_hidden[1]).
    """
    T, B, E = emb_tbe.shape
    H = w_hh.shape[1]
    G = 4 * H

    if T % chunk_t != 0:
        chunk_t = T                                      # simple fallback
    nc = T // chunk_t

    emb_tbe = emb_tbe.astype(jnp.bfloat16)               # halve HBM->VMEM bytes
    wih_t = jnp.transpose(w_ih).astype(jnp.bfloat16)     # [E, G]
    whh_t = jnp.transpose(w_hh).astype(jnp.bfloat16)     # [H, G]
    bias = (b_ih + b_hh).astype(jnp.float32).reshape(1, G)

    # Advisory cost estimate for XLA's scheduler.
    flops = 2 * T * B * E * G + 2 * T * B * H * G + 12 * T * B * G
    transcendentals = T * B * (G + H)
    bytes_accessed = (T * B * E * 2 + E * G * 2 + H * G * 2 + G * 4 + B * H * 4)

    # VMEM: double-buffered emb chunk + (re-used) weight tiles + out + scratch.
    buf_bytes = (2 * chunk_t * B * E * 2 + 2 * E * G * 2 + 2 * H * G * 2
                 + 2 * G * 4 + 2 * B * H * 4 + 3 * B * H * 4)
    vmem_limit = int(min(100 * 2**20, max(2 * 2**20, 4 * buf_bytes)))

    grid_spec = pltpu.PrefetchScalarGridSpec(
        num_scalar_prefetch=0,
        grid=(nc,),
        in_specs=[
            # Stream embedding chunks in REVERSE time order.
            pl.BlockSpec((chunk_t, B, E), lambda i: (nc - 1 - i, 0, 0)),
            pl.BlockSpec((E, G), lambda i: (0, 0)),       # W_ih^T (resident)
            pl.BlockSpec((1, G), lambda i: (0, 0)),       # bias   (resident)
            pl.BlockSpec((H, G), lambda i: (0, 0)),       # W_hh^T (resident)
        ],
        out_specs=pl.BlockSpec((B, H), lambda i: (0, 0)),
        scratch_shapes=[
            pltpu.VMEM((B, H), jnp.float32),              # h carry (f32)
            pltpu.VMEM((B, H), jnp.bfloat16),             # h carry (bf16, MXU operand)
            pltpu.VMEM((B, H), jnp.float32),              # c carry
        ],
    )

    return pl.pallas_call(
        _reverse_lstm_kernel,
        out_shape=jax.ShapeDtypeStruct((B, H), jnp.float32),
        grid_spec=grid_spec,
        compiler_params=pltpu.CompilerParams(
            dimension_semantics=("arbitrary",),           # serial carry across chunks
            vmem_limit_bytes=vmem_limit),
        cost_estimate=pl.CostEstimate(
            flops=flops, transcendentals=transcendentals,
            bytes_accessed=bytes_accessed),
    )(emb_tbe, wih_t, bias, whh_t)


def init_encoder_params(key, vocab_size, emb_size, hidden_size):
    """Deterministic synthetic parameters (shapes match the PyTorch module)."""
    k_emb, k_ih, k_hh, k_bih, k_bhh = jax.random.split(key, 5)
    H = hidden_size
    emb = jax.random.normal(k_emb, (vocab_size, emb_size), jnp.float32) * 0.1
    # Only the reverse-direction weights matter for last_hidden[-1].
    w_ih = jax.random.uniform(k_ih, (4 * H, emb_size), jnp.float32, -0.01, 0.01)
    w_hh, _ = jnp.linalg.qr(jax.random.normal(k_hh, (4 * H, H), jnp.float32))
    bound = 1.0 / jnp.sqrt(H)
    b_ih = jax.random.uniform(k_bih, (4 * H,), jnp.float32, -bound, bound)
    b_hh = jax.random.uniform(k_bhh, (4 * H,), jnp.float32, -bound, bound)
    return dict(emb=emb, w_ih=w_ih, w_hh=w_hh, b_ih=b_ih, b_hh=b_hh)


@jax.jit
def encoder_forward(params, token_ids):
    """token_ids: [B, T] int32  ->  [B, H] float32."""
    # Gather directly time-major (transpose the int ids, not the float slab).
    emb_tbe = params["emb"][token_ids.T]                  # [T, B, E] f32 gather
    h_last = reverse_lstm_last_hidden(
        emb_tbe, params["w_ih"], params["w_hh"], params["b_ih"], params["b_hh"])
    return h_last                                         # dropout: eval-mode identity


def _ref_forward(params, token_ids):
    """Pure-JAX f32 reference (mirrors PyTorch exactly)."""
    x = params["emb"][token_ids]                          # [B, T, E]
    B, T, _ = x.shape
    H = params["w_hh"].shape[1]
    h = jnp.zeros((B, H), jnp.float32)
    c = jnp.zeros((B, H), jnp.float32)
    for t in range(T - 1, -1, -1):
        gates = (x[:, t, :] @ params["w_ih"].T + h @ params["w_hh"].T
                 + params["b_ih"] + params["b_hh"])
        i = jax.nn.sigmoid(gates[:, 0 * H:1 * H])
        f = jax.nn.sigmoid(gates[:, 1 * H:2 * H])
        g = jnp.tanh(gates[:, 2 * H:3 * H])
        o = jax.nn.sigmoid(gates[:, 3 * H:4 * H])
        c = f * c + i * g
        h = o * jnp.tanh(c)
    return h


if __name__ == "__main__":
    VOCAB, EMB, HIDDEN = 50, 32, 32
    BATCH, SEQ = 2, 8

    key = jax.random.PRNGKey(0)
    k_params, k_ids = jax.random.split(key)
    params = init_encoder_params(k_params, VOCAB, EMB, HIDDEN)
    token_ids = jax.random.randint(k_ids, (BATCH, SEQ), 0, VOCAB, jnp.int32)

    out = jax.block_until_ready(encoder_forward(params, token_ids))
    ref = jax.block_until_ready(_ref_forward(params, token_ids))

    assert out.shape == (BATCH, HIDDEN)
    # Tolerance relaxed vs. the pure-f32 reference: embeddings and both weight
    # matrices are bf16 MXU operands (f32 accumulation); errors stay ~1e-3.
    assert jnp.allclose(out, ref, atol=1e-2, rtol=1e-2), "mismatch vs reference"

    print("KERNEL_OK")
</pallas_src>

<mosaic_0001>
module attributes {stable_mosaic.version = 11 : i64} {
  func.func @_reverse_lstm_kernel(%arg0: i32, %arg1: memref<4x2x32xbf16, #tpu.memory_space<vmem>>, %arg2: memref<32x128xbf16, #tpu.memory_space<vmem>>, %arg3: memref<1x128xf32, #tpu.memory_space<vmem>>, %arg4: memref<32x128xbf16, #tpu.memory_space<vmem>>, %arg5: memref<2x32xf32, #tpu.memory_space<vmem>>, %arg6: memref<2x32xf32, #tpu.memory_space<vmem>>, %arg7: memref<2x32xbf16, #tpu.memory_space<vmem>>, %arg8: memref<2x32xf32, #tpu.memory_space<vmem>>) attributes {dimension_semantics = [#tpu.dimension_semantics<arbitrary>], iteration_bounds = array<i64: 2>, scalar_prefetch = 0 : i64, scratch_operands = 3 : i64, tpu.core_type = #tpu.core_type<tc>, window_params = [{transform_indices = @transform_0, window_bounds = array<i64: 4, 2, 32>}, {pipeline_mode = #tpu.pipeline_mode<synchronous>, transform_indices = @transform_1, window_bounds = array<i64: 32, 128>}, {pipeline_mode = #tpu.pipeline_mode<synchronous>, transform_indices = @transform_2, window_bounds = array<i64: 1, 128>}, {pipeline_mode = #tpu.pipeline_mode<synchronous>, transform_indices = @transform_3, window_bounds = array<i64: 32, 128>}, {pipeline_mode = #tpu.pipeline_mode<synchronous>, transform_indices = @transform_4, window_bounds = array<i64: 2, 32>}]} {
    %c0_i32 = arith.constant 0 : i32
    %0 = arith.cmpi eq, %arg0, %c0_i32 : i32
    %1 = arith.extui %0 : i1 to i32
    %c0_i32_0 = arith.constant 0 : i32
    %2 = arith.cmpi ne, %1, %c0_i32_0 : i32
    scf.if %2 {
      %cst_48 = arith.constant 0.000000e+00 : f32
      %133 = vector.broadcast %cst_48 : f32 to vector<2x32xf32>
      %c0_49 = arith.constant 0 : index
      %c0_50 = arith.constant 0 : index
      %134 = vector.load %arg6[%c0_49, %c0_50] : memref<2x32xf32, #tpu.memory_space<vmem>>, vector<2x32xf32>
      tpu.vector_store %arg6[%c0_49, %c0_50], %133 {strides = array<i32>} : memref<2x32xf32, #tpu.memory_space<vmem>>, vector<2x32xf32>,
      %cst_51 = arith.constant 0.000000e+00 : bf16
      %135 = vector.broadcast %cst_51 : bf16 to vector<2x32xbf16>
      %c0_52 = arith.constant 0 : index
      %c0_53 = arith.constant 0 : index
      %136 = vector.load %arg7[%c0_52, %c0_53] : memref<2x32xbf16, #tpu.memory_space<vmem>>, vector<2x32xbf16>
      tpu.vector_store %arg7[%c0_52, %c0_53], %135 {strides = array<i32>} : memref<2x32xbf16, #tpu.memory_space<vmem>>, vector<2x32xbf16>,
      %cst_54 = arith.constant 0.000000e+00 : f32
      %137 = vector.broadcast %cst_54 : f32 to vector<2x32xf32>
      %c0_55 = arith.constant 0 : index
      %c0_56 = arith.constant 0 : index
      %138 = vector.load %arg8[%c0_55, %c0_56] : memref<2x32xf32, #tpu.memory_space<vmem>>, vector<2x32xf32>
      tpu.vector_store %arg8[%c0_55, %c0_56], %137 {strides = array<i32>} : memref<2x32xf32, #tpu.memory_space<vmem>>, vector<2x32xf32>,
    } else {
    }
    %3 = tpu.iota {dimensions = array<i32: 1>} : vector<2x128xi32>
    %c64_i32 = arith.constant 64 : i32
    %4 = vector.broadcast %c64_i32 : i32 to vector<2x128xi32>
    %5 = arith.cmpi sge, %3, %4 : vector<2x128xi32>
    %c96_i32 = arith.constant 96 : i32
    %6 = vector.broadcast %c96_i32 : i32 to vector<2x128xi32>
    %7 = arith.cmpi slt, %3, %6 : vector<2x128xi32>
    %8 = arith.andi %5, %7 : vector<2x128xi1>
    %cst = arith.constant 2.000000e+00 : f32
    %cst_1 = arith.constant 1.000000e+00 : f32
    %9 = vector.broadcast %cst : f32 to vector<2x128xf32>
    %10 = vector.broadcast %cst_1 : f32 to vector<2x128xf32>
    %11 = arith.select %8, %9, %10 : vector<2x128xi1>, vector<2x128xf32>
    %cst_2 = arith.constant -1.000000e+00 : f32
    %cst_3 = arith.constant 0.000000e+00 : f32
    %12 = vector.broadcast %cst_2 : f32 to vector<2x128xf32>
    %13 = vector.broadcast %cst_3 : f32 to vector<2x128xf32>
    %14 = arith.select %8, %12, %13 : vector<2x128xi1>, vector<2x128xf32>
    %c0 = arith.constant 0 : index
    %c0_4 = arith.constant 0 : index
    %15 = vector.load %arg3[%c0, %c0_4] : memref<1x128xf32, #tpu.memory_space<vmem>>, vector<1x128xf32>
    %16 = vector.shape_cast %15 : vector<1x128xf32> to vector<1x128xf32>
    %17 = vector.broadcast %16 : vector<1x128xf32> to vector<2x128xf32>
    %c0_5 = arith.constant 0 : index
    %c0_6 = arith.constant 0 : index
    %18 = vector.load %arg2[%c0_5, %c0_6] : memref<32x128xbf16, #tpu.memory_space<vmem>>, vector<32x128xbf16>
    %c0_7 = arith.constant 0 : index
    %c0_8 = arith.constant 0 : index
    %19 = vector.load %arg4[%c0_7, %c0_8] : memref<32x128xbf16, #tpu.memory_space<vmem>>, vector<32x128xbf16>
    %c0_9 = arith.constant 0 : index
    %c0_10 = arith.constant 0 : index
    %20 = vector.load %arg6[%c0_9, %c0_10] : memref<2x32xf32, #tpu.memory_space<vmem>>, vector<2x32xf32>
    %c0_11 = arith.constant 0 : index
    %c0_12 = arith.constant 0 : index
    %21 = vector.load %arg7[%c0_11, %c0_12] : memref<2x32xbf16, #tpu.memory_space<vmem>>, vector<2x32xbf16>
    %c0_13 = arith.constant 0 : index
    %c0_14 = arith.constant 0 : index
    %22 = vector.load %arg8[%c0_13, %c0_14] : memref<2x32xf32, #tpu.memory_space<vmem>>, vector<2x32xf32>
    %c0_i32_15 = arith.constant 0 : i32
    %c3_i32 = arith.constant 3 : i32
    %23 = arith.subi %c3_i32, %c0_i32_15 : i32
    %24 = arith.index_cast %23 : i32 to index
    %c0_16 = arith.constant 0 : index
    %c0_17 = arith.constant 0 : index
    %25 = vector.load %arg1[%24, %c0_16, %c0_17] : memref<4x2x32xbf16, #tpu.memory_space<vmem>>, vector<1x2x32xbf16>
    %26 = vector.shape_cast %25 : vector<1x2x32xbf16> to vector<2x32xbf16>
    %cst_18 = arith.constant dense<0.000000e+00> : vector<2x128xf32>
    %27 = tpu.matmul %26, %18, %cst_18 {dimension_numbers = #tpu.dot_dimension_numbers<[1], [0], [0], [1], [0, 0, 1, 1], [], []>} : vector<2x32xbf16>, vector<32x128xbf16>, vector<2x128xf32> -> vector<2x128xf32>
    %28 = arith.addf %27, %17 : vector<2x128xf32>
    %cst_19 = arith.constant dense<0.000000e+00> : vector<2x128xf32>
    %29 = tpu.matmul %21, %19, %cst_19 {dimension_numbers = #tpu.dot_dimension_numbers<[1], [0], [0], [1], [0, 0, 1, 1], [], []>} : vector<2x32xbf16>, vector<32x128xbf16>, vector<2x128xf32> -> vector<2x128xf32>
    %30 = arith.addf %28, %29 : vector<2x128xf32>
    %31 = arith.mulf %30, %11 : vector<2x128xf32>
    %32 = arith.negf %31 : vector<2x128xf32>
    %33 = math.exp %32 : vector<2x128xf32>
    %cst_20 = arith.constant 1.000000e+00 : f32
    %34 = vector.broadcast %cst_20 : f32 to vector<2x128xf32>
    %35 = arith.addf %34, %33 : vector<2x128xf32>
    %36 = arith.divf %34, %35 : vector<2x128xf32>
    %37 = arith.mulf %36, %11 : vector<2x128xf32>
    %38 = arith.addf %37, %14 : vector<2x128xf32>
    %39 = vector.extract_strided_slice %38 {offsets = [0, 0], sizes = [2, 32], strides = [1, 1]} : vector<2x128xf32> to vector<2x32xf32>
    %40 = vector.extract_strided_slice %38 {offsets = [0, 32], sizes = [2, 32], strides = [1, 1]} : vector<2x128xf32> to vector<2x32xf32>
    %41 = vector.extract_strided_slice %38 {offsets = [0, 64], sizes = [2, 32], strides = [1, 1]} : vector<2x128xf32> to vector<2x32xf32>
    %42 = vector.extract_strided_slice %38 {offsets = [0, 96], sizes = [2, 32], strides = [1, 1]} : vector<2x128xf32> to vector<2x32xf32>
    %43 = arith.mulf %40, %22 : vector<2x32xf32>
    %44 = arith.mulf %39, %41 : vector<2x32xf32>
    %45 = arith.addf %43, %44 : vector<2x32xf32>
    %46 = math.tanh %45 : vector<2x32xf32>
    %47 = arith.mulf %42, %46 : vector<2x32xf32>
    %48 = arith.truncf %47 : vector<2x32xf32> to vector<2x32xbf16>
    %c1_i32 = arith.constant 1 : i32
    %c3_i32_21 = arith.constant 3 : i32
    %49 = arith.subi %c3_i32_21, %c1_i32 : i32
    %50 = arith.index_cast %49 : i32 to index
    %c0_22 = arith.constant 0 : index
    %c0_23 = arith.constant 0 : index
    %51 = vector.load %arg1[%50, %c0_22, %c0_23] : memref<4x2x32xbf16, #tpu.memory_space<vmem>>, vector<1x2x32xbf16>
    %52 = vector.shape_cast %51 : vector<1x2x32xbf16> to vector<2x32xbf16>
    %cst_24 = arith.constant dense<0.000000e+00> : vector<2x128xf32>
    %53 = tpu.matmul %52, %18, %cst_24 {dimension_numbers = #tpu.dot_dimension_numbers<[1], [0], [0], [1], [0, 0, 1, 1], [], []>} : vector<2x32xbf16>, vector<32x128xbf16>, vector<2x128xf32> -> vector<2x128xf32>
    %54 = arith.addf %53, %17 : vector<2x128xf32>
    %cst_25 = arith.constant dense<0.000000e+00> : vector<2x128xf32>
    %55 = tpu.matmul %48, %19, %cst_25 {dimension_numbers = #tpu.dot_dimension_numbers<[1], [0], [0], [1], [0, 0, 1, 1], [], []>} : vector<2x32xbf16>, vector<32x128xbf16>, vector<2x128xf32> -> vector<2x128xf32>
    %56 = arith.addf %54, %55 : vector<2x128xf32>
    %57 = arith.mulf %56, %11 : vector<2x128xf32>
    %58 = arith.negf %57 : vector<2x128xf32>
    %59 = math.exp %58 : vector<2x128xf32>
    %cst_26 = arith.constant 1.000000e+00 : f32
    %60 = vector.broadcast %cst_26 : f32 to vector<2x128xf32>
    %61 = arith.addf %60, %59 : vector<2x128xf32>
    %62 = arith.divf %60, %61 : vector<2x128xf32>
    %63 = arith.mulf %62, %11 : vector<2x128xf32>
    %64 = arith.addf %63, %14 : vector<2x128xf32>
    %65 = vector.extract_strided_slice %64 {offsets = [0, 0], sizes = [2, 32], strides = [1, 1]} : vector<2x128xf32> to vector<2x32xf32>
    %66 = vector.extract_strided_slice %64 {offsets = [0, 32], sizes = [2, 32], strides = [1, 1]} : vector<2x128xf32> to vector<2x32xf32>
    %67 = vector.extract_strided_slice %64 {offsets = [0, 64], sizes = [2, 32], strides = [1, 1]} : vector<2x128xf32> to vector<2x32xf32>
    %68 = vector.extract_strided_slice %64 {offsets = [0, 96], sizes = [2, 32], strides = [1, 1]} : vector<2x128xf32> to vector<2x32xf32>
    %69 = arith.mulf %66, %45 : vector<2x32xf32>
    %70 = arith.mulf %65, %67 : vector<2x32xf32>
    %71 = arith.addf %69, %70 : vector<2x32xf32>
    %72 = math.tanh %71 : vector<2x32xf32>
    %73 = arith.mulf %68, %72 : vector<2x32xf32>
    %74 = arith.truncf %73 : vector<2x32xf32> to vector<2x32xbf16>
    %c2_i32 = arith.constant 2 : i32
    %c3_i32_27 = arith.constant 3 : i32
    %75 = arith.subi %c3_i32_27, %c2_i32 : i32
    %76 = arith.index_cast %75 : i32 to index
    %c0_28 = arith.constant 0 : index
    %c0_29 = arith.constant 0 : index
    %77 = vector.load %arg1[%76, %c0_28, %c0_29] : memref<4x2x32xbf16, #tpu.memory_space<vmem>>, vector<1x2x32xbf16>
    %78 = vector.shape_cast %77 : vector<1x2x32xbf16> to vector<2x32xbf16>
    %cst_30 = arith.constant dense<0.000000e+00> : vector<2x128xf32>
    %79 = tpu.matmul %78, %18, %cst_30 {dimension_numbers = #tpu.dot_dimension_numbers<[1], [0], [0], [1], [0, 0, 1, 1], [], []>} : vector<2x32xbf16>, vector<32x128xbf16>, vector<2x128xf32> -> vector<2x128xf32>
    %80 = arith.addf %79, %17 : vector<2x128xf32>
    %cst_31 = arith.constant dense<0.000000e+00> : vector<2x128xf32>
    %81 = tpu.matmul %74, %19, %cst_31 {dimension_numbers = #tpu.dot_dimension_numbers<[1], [0], [0], [1], [0, 0, 1, 1], [], []>} : vector<2x32xbf16>, vector<32x128xbf16>, vector<2x128xf32> -> vector<2x128xf32>
    %82 = arith.addf %80, %81 : vector<2x128xf32>
    %83 = arith.mulf %82, %11 : vector<2x128xf32>
    %84 = arith.negf %83 : vector<2x128xf32>
    %85 = math.exp %84 : vector<2x128xf32>
    %cst_32 = arith.constant 1.000000e+00 : f32
    %86 = vector.broadcast %cst_32 : f32 to vector<2x128xf32>
    %87 = arith.addf %86, %85 : vector<2x128xf32>
    %88 = arith.divf %86, %87 : vector<2x128xf32>
    %89 = arith.mulf %88, %11 : vector<2x128xf32>
    %90 = arith.addf %89, %14 : vector<2x128xf32>
    %91 = vector.extract_strided_slice %90 {offsets = [0, 0], sizes = [2, 32], strides = [1, 1]} : vector<2x128xf32> to vector<2x32xf32>
    %92 = vector.extract_strided_slice %90 {offsets = [0, 32], sizes = [2, 32], strides = [1, 1]} : vector<2x128xf32> to vector<2x32xf32>
    %93 = vector.extract_strided_slice %90 {offsets = [0, 64], sizes = [2, 32], strides = [1, 1]} : vector<2x128xf32> to vector<2x32xf32>
    %94 = vector.extract_strided_slice %90 {offsets = [0, 96], sizes = [2, 32], strides = [1, 1]} : vector<2x128xf32> to vector<2x32xf32>
    %95 = arith.mulf %92, %71 : vector<2x32xf32>
    %96 = arith.mulf %91, %93 : vector<2x32xf32>
    %97 = arith.addf %95, %96 : vector<2x32xf32>
    %98 = math.tanh %97 : vector<2x32xf32>
    %99 = arith.mulf %94, %98 : vector<2x32xf32>
    %100 = arith.truncf %99 : vector<2x32xf32> to vector<2x32xbf16>
    %c3_i32_33 = arith.constant 3 : i32
    %c3_i32_34 = arith.constant 3 : i32
    %101 = arith.subi %c3_i32_34, %c3_i32_33 : i32
    %102 = arith.index_cast %101 : i32 to index
    %c0_35 = arith.constant 0 : index
    %c0_36 = arith.constant 0 : index
    %103 = vector.load %arg1[%102, %c0_35, %c0_36] : memref<4x2x32xbf16, #tpu.memory_space<vmem>>, vector<1x2x32xbf16>
    %104 = vector.shape_cast %103 : vector<1x2x32xbf16> to vector<2x32xbf16>
    %cst_37 = arith.constant dense<0.000000e+00> : vector<2x128xf32>
    %105 = tpu.matmul %104, %18, %cst_37 {dimension_numbers = #tpu.dot_dimension_numbers<[1], [0], [0], [1], [0, 0, 1, 1], [], []>} : vector<2x32xbf16>, vector<32x128xbf16>, vector<2x128xf32> -> vector<2x128xf32>
    %106 = arith.addf %105, %17 : vector<2x128xf32>
    %cst_38 = arith.constant dense<0.000000e+00> : vector<2x128xf32>
    %107 = tpu.matmul %100, %19, %cst_38 {dimension_numbers = #tpu.dot_dimension_numbers<[1], [0], [0], [1], [0, 0, 1, 1], [], []>} : vector<2x32xbf16>, vector<32x128xbf16>, vector<2x128xf32> -> vector<2x128xf32>
    %108 = arith.addf %106, %107 : vector<2x128xf32>
    %109 = arith.mulf %108, %11 : vector<2x128xf32>
    %110 = arith.negf %109 : vector<2x128xf32>
    %111 = math.exp %110 : vector<2x128xf32>
    %cst_39 = arith.constant 1.000000e+00 : f32
    %112 = vector.broadcast %cst_39 : f32 to vector<2x128xf32>
    %113 = arith.addf %112, %111 : vector<2x128xf32>
    %114 = arith.divf %112, %113 : vector<2x128xf32>
    %115 = arith.mulf %114, %11 : vector<2x128xf32>
    %116 = arith.addf %115, %14 : vector<2x128xf32>
    %117 = vector.extract_strided_slice %116 {offsets = [0, 0], sizes = [2, 32], strides = [1, 1]} : vector<2x128xf32> to vector<2x32xf32>
    %118 = vector.extract_strided_slice %116 {offsets = [0, 32], sizes = [2, 32], strides = [1, 1]} : vector<2x128xf32> to vector<2x32xf32>
    %119 = vector.extract_strided_slice %116 {offsets = [0, 64], sizes = [2, 32], strides = [1, 1]} : vector<2x128xf32> to vector<2x32xf32>
    %120 = vector.extract_strided_slice %116 {offsets = [0, 96], sizes = [2, 32], strides = [1, 1]} : vector<2x128xf32> to vector<2x32xf32>
    %121 = arith.mulf %118, %97 : vector<2x32xf32>
    %122 = arith.mulf %117, %119 : vector<2x32xf32>
    %123 = arith.addf %121, %122 : vector<2x32xf32>
    %124 = math.tanh %123 : vector<2x32xf32>
    %125 = arith.mulf %120, %124 : vector<2x32xf32>
    %126 = arith.truncf %125 : vector<2x32xf32> to vector<2x32xbf16>
    %c4_i32 = arith.constant 4 : i32
    %c0_40 = arith.constant 0 : index
    %c0_41 = arith.constant 0 : index
    %127 = vector.load %arg6[%c0_40, %c0_41] : memref<2x32xf32, #tpu.memory_space<vmem>>, vector<2x32xf32>
    tpu.vector_store %arg6[%c0_40, %c0_41], %125 {strides = array<i32>} : memref<2x32xf32, #tpu.memory_space<vmem>>, vector<2x32xf32>,
    %c0_42 = arith.constant 0 : index
    %c0_43 = arith.constant 0 : index
    %128 = vector.load %arg7[%c0_42, %c0_43] : memref<2x32xbf16, #tpu.memory_space<vmem>>, vector<2x32xbf16>
    tpu.vector_store %arg7[%c0_42, %c0_43], %126 {strides = array<i32>} : memref<2x32xbf16, #tpu.memory_space<vmem>>, vector<2x32xbf16>,
    %c0_44 = arith.constant 0 : index
    %c0_45 = arith.constant 0 : index
    %129 = vector.load %arg8[%c0_44, %c0_45] : memref<2x32xf32, #tpu.memory_space<vmem>>, vector<2x32xf32>
    tpu.vector_store %arg8[%c0_44, %c0_45], %123 {strides = array<i32>} : memref<2x32xf32, #tpu.memory_space<vmem>>, vector<2x32xf32>,
    %c1_i32_46 = arith.constant 1 : i32
    %130 = arith.cmpi eq, %arg0, %c1_i32_46 : i32
    %131 = arith.extui %130 : i1 to i32
    %c0_i32_47 = arith.constant 0 : i32
    %132 = arith.cmpi ne, %131, %c0_i32_47 : i32
    scf.if %132 {
      %c0_48 = arith.constant 0 : index
      %c0_49 = arith.constant 0 : index
      %133 = vector.load %arg5[%c0_48, %c0_49] : memref<2x32xf32, #tpu.memory_space<vmem>>, vector<2x32xf32>
      tpu.vector_store %arg5[%c0_48, %c0_49], %125 {strides = array<i32>} : memref<2x32xf32, #tpu.memory_space<vmem>>, vector<2x32xf32>,
    } else {
    }
    return
  }
  func.func @transform_0(%arg0: i32) -> (i32, i32, i32) {
    %c1_i32 = arith.constant 1 : i32
    %0 = arith.subi %c1_i32, %arg0 : i32
    %c0_i32 = arith.constant 0 : i32
    %c0_i32_0 = arith.constant 0 : i32
    %c0_i32_1 = arith.constant 0 : i32
    return %0, %c0_i32, %c0_i32_0 : i32, i32, i32
  }
  func.func @transform_1(%arg0: i32) -> (i32, i32) {
    %c0_i32 = arith.constant 0 : i32
    %c0_i32_0 = arith.constant 0 : i32
    %c0_i32_1 = arith.constant 0 : i32
    return %c0_i32, %c0_i32_0 : i32, i32
  }
  func.func @transform_2(%arg0: i32) -> (i32, i32) {
    %c0_i32 = arith.constant 0 : i32
    %c0_i32_0 = arith.constant 0 : i32
    %c0_i32_1 = arith.constant 0 : i32
    return %c0_i32, %c0_i32_0 : i32, i32
  }
  func.func @transform_3(%arg0: i32) -> (i32, i32) {
    %c0_i32 = arith.constant 0 : i32
    %c0_i32_0 = arith.constant 0 : i32
    %c0_i32_1 = arith.constant 0 : i32
    return %c0_i32, %c0_i32_0 : i32, i32
  }
  func.func @transform_4(%arg0: i32) -> (i32, i32) {
    %c0_i32 = arith.constant 0 : i32
    %c0_i32_0 = arith.constant 0 : i32
    %c0_i32_1 = arith.constant 0 : i32
    return %c0_i32, %c0_i32_0 : i32, i32
  }
}

</mosaic_0001>

<bundles_post_ra>
// kernel: encoder_forward.1
= control target key start
LH: loop header
LB: loop body
LE: loop exit
PB: predicated region body
PF: predicated region fallthrough
CT: control target
= control target key end

     0   :  { %9 = vsyncpa [#allocation6], 0  ;;  %s797_s15 = smov 0   ;;  %s897_s0 = inlined_call_operand.vmem [shape: bf16[8,2,32], index: 0, kind: input, shape index: {}]   ;;  %s898_s1 = inlined_call_operand.vmem [shape: bf16[32,128], index: 1, kind: input, shape index: {}]   ;;  %s899_s2 = inlined_call_operand.vmem [shape: f32[1,128], index: 2, kind: input, shape index: {}]   ;;  %s900_s3 = inlined_call_operand.vmem [shape: bf16[32,128], index: 3, kind: input, shape index: {}]   ;;  %s901_s4 = inlined_call_operand.hbm [shape: f32[2,32], index: 4, kind: output, shape index: {}]  }
   0x1 LB: > { %s803_s16 = sadd.s32 4294967295, %s762_s15   ;;  %p634_p0 = scmp.ge.s32.totalorder %s762_s15, 1  ;;  %s762_s15 = sphi %s797_s15, %s15_s15  }
   0x2   : > { %p162_p1 = scmp.lt.s32.totalorder %s762_s15, 3 }
   0x4   : > { %p163_p2 = pnand %p634_p0, %p162_p1 }
   0x5   : > { %s183_s17 = ssub.s32 (!%p163_p2), 1, %s803_s16  ;;  %p636_p4 = scmp.ne.s32.totalorder (!%p163_p2), %s803_s16, 0 }
   0x6   : > { %166 = sbr.rel (%p163_p2) target bundleno = 2473 (0x9a9), region = 36  ;;  %s635_s18 = sshll.u32 (!%p163_p2), %s183_s17, 2 }
   0x7   : > { %p185_p3 = scmp.lt.s32.totalorder (!%p163_p2), %s635_s18, 7 }
   0xb   : > { %s905_s18 = smov (!%p185_p3, %s635_s18), 7  ;;  %194 = sbr.rel (%p636_p4) target bundleno = 19 (0x13), region = 40 }
   0xc   : > { %s811_s21 = scalar_lea.vmem %s897_s0, %s905_s18 }
  0x10   : > { %vm195_vm0 = vcmask 254976   ;;  %vm197_vm1 = vcmask 253952   ;;  %v764_v0 = vmov 0.0   ;;  %v765_v1 = vmov 0  }
  0x11   : > { %199 = vst.msk [vmem:[#allocation4] sm:$0x3] %vm195_vm0, %v764_v0 }
  0x12   : > { %198 = vst.msk [vmem:[#allocation3] sm:$0x1] %vm197_vm1, %v765_v1 }
  0x13 PF: > { %v674_v2 = vld [vmem:[%s898_s1 + $0x8] sm:$0xff]  ;;  %v673_v4 = vld [vmem:[%s898_s1] sm:$0xff]  ;;  %vm235_vm2 = vcmask 261120   ;;  %v200_v8 = vlaneseq  ;;  %v766_v15 = vmov 1.0   ;;  %v767_v33 = vmov 0.0   ;;  %s768_s6 = smov 64  }
  0x14   : > { %v676_v3 = vld [vmem:[%s900_s3 + $0x8] sm:$0xff]  ;;  %245 = vmatpush.bf16.msra.mxu0 %v674_v2  ;;  %v675_v5 = vld [vmem:[%s900_s3] sm:$0xff]  ;;  %336 = vmatpush.bf16.msra.mxu2 %v674_v2  ;;  %s769_s7 = smov 32   ;;  %s770_s8 = smov 96  }
  0x15   : > { %273 = vmatpush.bf16.msra.mxu1 %v676_v3  ;;  %355 = vmatpush.bf16.msra.mxu3 %v676_v3  ;;  %v637_v6 = vld [vmem:[%s811_s21 + $0x3] sm:$0x1]  ;;  %v201_v9 = vand.u32 127, %v200_v8  ;;  %v832_v10 = vld [vmem:[%s899_s2] ss:$0 sm:$0xff]  ;;  %p668_p5 = scmp.ne.s32.totalorder %s803_s16, 1 }
  0x16   : > { %v657_v46 = vld [vmem:[%s811_s21 + $0x2] sm:$0x1] }
  0x17   : > { %vm202_vm3 = vcmp.ge.s32.totalorder %v201_v9, 64  ;;  %vm203_vm4 = vcmp.lt.s32.totalorder %v201_v9, 96 }
  0x18   : > { %246 = vmatpush.bf16.msra.mxu0 %v673_v4  ;;  %337 = vmatpush.bf16.msra.mxu2 %v673_v4  ;;  %vm834_vm5 = vmand %vm202_vm3, %vm203_vm4  ;;  %v220_v38 = vld [vmem:[#allocation4] sm:$0x3] }
  0x19   : > { %274 = vmatpush.bf16.msra.mxu1 %v675_v5  ;;  %v219_v7 = vld [vmem:[#allocation3] sm:$0x1]  ;;  %356 = vmatpush.bf16.msra.mxu3 %v675_v5  ;;  %v841_v16 = vsel %vm834_vm5, 2.0, %v766_v15  ;;  %v846_v34 = vsel %vm834_vm5, -1.0, %v767_v33 }
  0x1b   : > { %646 = vmatmul.msk.bf16.vlgmr.msra.gmra.mxu0 %vm235_vm2, %v637_v6  ;;  %658 = vmatmul.msk.bf16.vlgmr.msra.gmra.mxu2 %vm235_vm2, %v657_v46 }
  0x1c   : > { %414 = vmatpush.bf16.msrb.mxu0 %v674_v2  ;;  %655 = vmatmul.msk.bf16.vlgmr.msra.gmra.mxu1 %vm235_vm2, %v219_v7 }
  0x1d   : > { %433 = vmatpush.bf16.msrb.mxu1 %v676_v3  ;;  %491 = vmatpush.bf16.msrb.mxu2 %v674_v2 }
  0x1e   : > { %510 = vmatpush.bf16.msrb.mxu3 %v676_v3 }
  0x20   : > { %415 = vmatpush.bf16.msrb.mxu0 %v673_v4 }
  0x21   : > { %434 = vmatpush.bf16.msrb.mxu1 %v675_v5  ;;  %492 = vmatpush.bf16.msrb.mxu2 %v673_v4 }
  0x22   : > { %511 = vmatpush.bf16.msrb.mxu3 %v675_v5 }
  0x98   : > { %v248_v12 = vpop.f32.mrf.mxu0 }
  0x99   : > { %v276_v13 = vpop.f32.mrf.mxu1  ;;  %v249_v14 = vadd.f32 %v832_v10, %v248_v12 }
  0x9b   : > { %v280_v17 = vadd.f32 %v276_v13, %v249_v14 }
  0x9d   : > { %v281_v18 = vmul.f32 %v280_v17, %v841_v16  ;;  %v661_v17 = vld [vmem:[%s811_s21 + $0x1] sm:$0x1] }
  0x9e   : > { %v339_v51 = vpop.f32.mrf.mxu2  ;;  %662 = vmatmul.msk.bf16.vlgmr.msrb.gmra.mxu0 %vm235_vm2, %v661_v17 }
  0x9f   : > { %v656_v19 = vmul.f32 -1.442695, %v281_v18  ;;  %v340_v53 = vadd.f32 %v832_v10, %v339_v51  ;;  %v481_v51 = vld [vmem:[%s811_s21] sm:$0x1] }
  0xa0   : > { %v250_v20 = vpop.f32.mrf.mxu0  ;;  %665 = vmatmul.msk.bf16.vlgmr.msrb.gmra.mxu2 %vm235_vm2, %v481_v51 }
  0xa1   : > { %v278_v21 = vpop.f32.mrf.mxu1  ;;  %700 = vpow2.f32 %v656_v19 }
  0xa6   : > { %v341_v52 = vpop.f32.mrf.mxu2 }
  0xa7   : > { %v701_v22 = vpop.eup %700 }
  0xa8   : > { %v285_v23 = vadd.f32 1.0, %v701_v22 }
  0xaa   : > { %702 = vrcp.f32 %v285_v23  ;;  %v297_v27 = vand.u32 2147483648, %v285_v23  ;;  %v295_v29 = vand.u32 2147483647, %v285_v23  ;;  %vm291_vm7 = vweird.f32 %v285_v23 }
  0xac   : > { %v298_v31 = vor.u32 1.1754944e-38, %v297_v27  ;;  %vm296_vm9 = vcmp.eq.f32.partialorder %v295_v29, 8.507059e+37 }
  0xb0   : > { %v703_v24 = vpop.eup %702 }
  0xb1   : > { %v287_v25 = vmul.f32 %v703_v24, %v285_v23  ;;  %vm292_vm6 = vweird.f32 %v703_v24 }
  0xb2   : > { %vm293_vm8 = vmor %vm291_vm7, %vm292_vm6  ;;  %vm566_vm6 = vcmask 1040384   ;;  %vm562_vm7 = vcmask 254976  }
  0xb3   : > { %v288_v26 = vsub.f32 1.0, %v287_v25 }
  0xb5   : > { %v289_v28 = vmul.f32 %v703_v24, %v288_v26 }
  0xb7   : > { %v290_v30 = vadd.f32 %v703_v24, %v289_v28 }
  0xb9   : > { %v294_v32 = vsel %vm293_vm8, %v703_v24, %v290_v30  ;;  %vm574_vm8 = vcmask 253952  }
  0xba   : > { %v299_v35 = vsel %vm296_vm9, %v298_v31, %v294_v32 }
  0xbb   : > { %v301_v36 = vmul.f32 %v299_v35, %v841_v16 }
  0xbd   : > { %v302_v37 = vadd.f32 %v301_v36, %v846_v34 }
  0xbf   : > { %309 = vrot.lane.b32.xlu0 %v302_v37, %s768_s6 }
  0xc7   : > { %304 = vrot.lane.b32.xlu0 %v220_v38, %s769_s7 }
 0x11b   : > { %v417_v22 = vpop.f32.mrf.mxu0 }
 0x11c   : > { %v418_v24 = vadd.f32 %v832_v10, %v417_v22 }
 0x123   : > { %v419_v23 = vpop.f32.mrf.mxu0 }
 0x131   : > { %v310_v39 = vpop.permute.xlu0 %309 }
 0x132   : > { %v312_v40 = vmul.f32 %v310_v39, %v302_v37 }
 0x134   : > { %314 = vrot.lane.b32.xlu1 %v312_v40, %s769_s7 }
 0x139   : > { %v305_v41 = vpop.permute.xlu0 %304 }
 0x13a   : > { %v307_v42 = vmul.f32 %v305_v41, %v302_v37 }
 0x1a6   : > { %v315_v43 = vpop.permute.xlu1 %314 }
 0x1a7   : > { %v317_v44 = vadd.f32 %v315_v43, %v307_v42 }
 0x1a9   : > { %704 = vtanh.f32 %v317_v44 }
 0x1af   : > { %v705_v45 = vpop.eup %704 }
 0x1b0   : > { %320 = vrot.lane.b32.xlu1 %v705_v45, %s768_s6 }
 0x222   : > { %v321_v47 = vpop.permute.xlu1 %320 }
 0x223   : > { %v323_v48 = vmul.f32 %v321_v47, %v302_v37 }
 0x225   : > { %v324_v49 = vpack.c.bf16 %v323_v48, %v323_v48 }
 0x227   : > { %344 = vrot.lane.b32.xlu2 %v324_v49, %s769_s7 }
 0x281   : > { %v345_v50 = vpop.permute.xlu2 %344 }
 0x282   : > { %659 = vmatmul.msk.bf16.vlgmr.msra.gmra.mxu3 %vm235_vm2, %v345_v50 }
 0x305   : > { %v358_v54 = vpop.f32.mrf.mxu3 }
 0x306   : > { %v362_v55 = vadd.f32 %v358_v54, %v340_v53 }
 0x308   : > { %v363_v56 = vmul.f32 %v362_v55, %v841_v16  ;;  %v494_v55 = vpop.f32.mrf.mxu2 }
 0x30a   : > { %v660_v57 = vmul.f32 -1.442695, %v363_v56 }
 0x30c   : > { %706 = vpow2.f32 %v660_v57 }
 0x30d   : > { %v360_v58 = vpop.f32.mrf.mxu3 }
 0x30e   : > { %v495_v58 = vadd.f32 %v832_v10, %v494_v55 }
 0x310   : > { %v496_v56 = vpop.f32.mrf.mxu2 }
 0x312   : > { %v707_v59 = vpop.eup %706 }
 0x313   : > { %v367_v60 = vadd.f32 1.0, %v707_v59 }
 0x315   : > { %708 = vrcp.f32 %v367_v60  ;;  %v379_v0 = vand.u32 2147483648, %v367_v60  ;;  %v377_v2 = vand.u32 2147483647, %v367_v60  ;;  %vm373_vm11 = vweird.f32 %v367_v60 }
 0x317   : > { %v380_v4 = vor.u32 1.1754944e-38, %v379_v0  ;;  %vm378_vm13 = vcmp.eq.f32.partialorder %v377_v2, 8.507059e+37 }
 0x31b   : > { %v709_v61 = vpop.eup %708 }
 0x31c   : > { %v369_v62 = vmul.f32 %v709_v61, %v367_v60  ;;  %vm374_vm10 = vweird.f32 %v709_v61 }
 0x31d   : > { %vm375_vm12 = vmor %vm373_vm11, %vm374_vm10 }
 0x31e   : > { %v370_v63 = vsub.f32 1.0, %v369_v62 }
 0x320   : > { %v371_v1 = vmul.f32 %v709_v61, %v370_v63 }
 0x322   : > { %v372_v3 = vadd.f32 %v709_v61, %v371_v1 }
 0x324   : > { %v376_v5 = vsel %vm375_vm12, %v709_v61, %v372_v3 }
 0x325   : > { %v381_v6 = vsel %vm378_vm13, %v380_v4, %v376_v5 }
 0x326   : > { %v383_v7 = vmul.f32 %v381_v6, %v841_v16 }
 0x328   : > { %v384_v8 = vadd.f32 %v383_v7, %v846_v34 }
 0x32a   : > { %387 = vrot.lane.b32.xlu2 %v384_v8, %s768_s6  ;;  %v385_v12 = vmul.f32 %v384_v8, %v317_v44 }
 0x384   : > { %v388_v9 = vpop.permute.xlu2 %387 }
 0x385   : > { %v390_v11 = vmul.f32 %v388_v9, %v384_v8 }
 0x387   : > { %392 = vrot.lane.b32.xlu0 %v390_v11, %s769_s7 }
 0x3f9   : > { %v393_v13 = vpop.permute.xlu0 %392 }
 0x3fa   : > { %v395_v14 = vadd.f32 %v393_v13, %v385_v12 }
 0x3fc   : > { %710 = vtanh.f32 %v395_v14 }
 0x402   : > { %v711_v15 = vpop.eup %710 }
 0x403   : > { %398 = vrot.lane.b32.xlu1 %v711_v15, %s768_s6 }
 0x475   : > { %v399_v18 = vpop.permute.xlu1 %398 }
 0x476   : > { %v401_v19 = vmul.f32 %v399_v18, %v384_v8 }
 0x478   : > { %v402_v20 = vpack.c.bf16 %v401_v19, %v401_v19 }
 0x47a   : > { %422 = vrot.lane.b32.xlu2 %v402_v20, %s769_s7 }
 0x4d4   : > { %v423_v21 = vpop.permute.xlu2 %422 }
 0x4d5   : > { %663 = vmatmul.msk.bf16.vlgmr.msrb.gmra.mxu1 %vm235_vm2, %v423_v21 }
 0x552   : > { %v436_v25 = vpop.f32.mrf.mxu1 }
 0x553   : > { %v440_v26 = vadd.f32 %v436_v25, %v418_v24 }
 0x555   : > { %v441_v27 = vmul.f32 %v440_v26, %v841_v16 }
 0x557   : > { %v664_v28 = vmul.f32 -1.442695, %v441_v27 }
 0x559   : > { %712 = vpow2.f32 %v664_v28 }
 0x55a   : > { %v438_v29 = vpop.f32.mrf.mxu1 }
 0x55f   : > { %v713_v30 = vpop.eup %712 }
 0x560   : > { %v445_v31 = vadd.f32 1.0, %v713_v30 }
 0x562   : > { %714 = vrcp.f32 %v445_v31  ;;  %v457_v36 = vand.u32 2147483648, %v445_v31  ;;  %v455_v38 = vand.u32 2147483647, %v445_v31  ;;  %vm451_vm15 = vweird.f32 %v445_v31 }
 0x564   : > { %v458_v40 = vor.u32 1.1754944e-38, %v457_v36  ;;  %vm456_vm1 = vcmp.eq.f32.partialorder %v455_v38, 8.507059e+37 }
 0x568   : > { %v715_v32 = vpop.eup %714 }
 0x569   : > { %v447_v33 = vmul.f32 %v715_v32, %v445_v31  ;;  %vm452_vm14 = vweird.f32 %v715_v32 }
 0x56a   : > { %vm453_vm0 = vmor %vm451_vm15, %vm452_vm14 }
 0x56b   : > { %v448_v35 = vsub.f32 1.0, %v447_v33 }
 0x56d   : > { %v449_v37 = vmul.f32 %v715_v32, %v448_v35 }
 0x56f   : > { %v450_v39 = vadd.f32 %v715_v32, %v449_v37 }
 0x571   : > { %v454_v41 = vsel %vm453_vm0, %v715_v32, %v450_v39 }
 0x572   : > { %v459_v42 = vsel %vm456_vm1, %v458_v40, %v454_v41 }
 0x573   : > { %v461_v43 = vmul.f32 %v459_v42, %v841_v16 }
 0x575   : > { %v462_v44 = vadd.f32 %v461_v43, %v846_v34 }
 0x577   : > { %465 = vrot.lane.b32.xlu0 %v462_v44, %s768_s6  ;;  %v463_v47 = vmul.f32 %v462_v44, %v395_v14 }
 0x5e9   : > { %v466_v45 = vpop.permute.xlu0 %465 }
 0x5ea   : > { %v468_v46 = vmul.f32 %v466_v45, %v462_v44 }
 0x5ec   : > { %470 = vrot.lane.b32.xlu1 %v468_v46, %s769_s7 }
 0x65e   : > { %v471_v48 = vpop.permute.xlu1 %470 }
 0x65f   : > { %v473_v49 = vadd.f32 %v471_v48, %v463_v47 }
 0x661   : > { %716 = vtanh.f32 %v473_v49 }
 0x667   : > { %v717_v50 = vpop.eup %716 }
 0x668   : > { %476 = vrot.lane.b32.xlu2 %v717_v50, %s768_s6 }
 0x6c2   : > { %v477_v52 = vpop.permute.xlu2 %476 }
 0x6c3   : > { %v479_v53 = vmul.f32 %v477_v52, %v462_v44 }
 0x6c5   : > { %v480_v54 = vpack.c.bf16 %v479_v53, %v479_v53 }
 0x6c7   : > { %499 = vrot.lane.b32.xlu0 %v480_v54, %s769_s7 }
 0x739   : > { %v500_v57 = vpop.permute.xlu0 %499 }
 0x73a   : > { %666 = vmatmul.msk.bf16.vlgmr.msrb.gmra.mxu3 %vm235_vm2, %v500_v57 }
 0x7bd   : > { %v513_v59 = vpop.f32.mrf.mxu3 }
 0x7be   : > { %v517_v60 = vadd.f32 %v513_v59, %v495_v58 }
 0x7c0   : > { %v518_v61 = vmul.f32 %v517_v60, %v841_v16 }
 0x7c2   : > { %v667_v62 = vmul.f32 -1.442695, %v518_v61 }
 0x7c4   : > { %718 = vpow2.f32 %v667_v62 }
 0x7c5   : > { %v515_v63 = vpop.f32.mrf.mxu3 }
 0x7ca   : > { %v719_v0 = vpop.eup %718 }
 0x7cb   : > { %v522_v1 = vadd.f32 1.0, %v719_v0 }
 0x7cd   : > { %720 = vrcp.f32 %v522_v1  ;;  %v534_v5 = vand.u32 2147483648, %v522_v1  ;;  %v532_v7 = vand.u32 2147483647, %v522_v1  ;;  %vm528_vm2 = vweird.f32 %v522_v1 }
 0x7cf   : > { %v535_v10 = vor.u32 1.1754944e-38, %v534_v5  ;;  %vm533_vm5 = vcmp.eq.f32.partialorder %v532_v7, 8.507059e+37 }
 0x7d3   : > { %v721_v2 = vpop.eup %720 }
 0x7d4   : > { %v524_v3 = vmul.f32 %v721_v2, %v522_v1  ;;  %vm529_vm3 = vweird.f32 %v721_v2 }
 0x7d5   : > { %vm530_vm4 = vmor %vm528_vm2, %vm529_vm3 }
 0x7d6   : > { %v525_v4 = vsub.f32 1.0, %v524_v3 }
 0x7d8   : > { %v526_v6 = vmul.f32 %v721_v2, %v525_v4 }
 0x7da   : > { %v527_v8 = vadd.f32 %v721_v2, %v526_v6 }
 0x7dc   : > { %v531_v9 = vsel %vm530_vm4, %v721_v2, %v527_v8 }
 0x7dd   : > { %v536_v11 = vsel %vm533_vm5, %v535_v10, %v531_v9 }
 0x7de   : > { %v538_v12 = vmul.f32 %v536_v11, %v841_v16 }
 0x7e0   : > { %v539_v13 = vadd.f32 %v538_v12, %v846_v34 }
 0x7e2   : > { %542 = vrot.lane.b32.xlu1 %v539_v13, %s768_s6  ;;  %v540_v17 = vmul.f32 %v539_v13, %v473_v49 }
 0x854   : > { %v543_v14 = vpop.permute.xlu1 %542 }
 0x855   : > { %v545_v15 = vmul.f32 %v543_v14, %v539_v13 }
 0x857   : > { %547 = vrot.lane.b32.xlu2 %v545_v15, %s769_s7 }
 0x8b1   : > { %v548_v18 = vpop.permute.xlu2 %547 }
 0x8b2   : > { %v550_v19 = vadd.f32 %v548_v18, %v540_v17 }
 0x8b4   : > { %722 = vtanh.f32 %v550_v19 }
 0x8ba   : > { %v723_v20 = vpop.eup %722 }
 0x8bb   : > { %553 = vrot.lane.b32.xlu0 %v723_v20, %s768_s6 }
 0x8c3   : > { %577 = vrot.lane.b32.xlu0 %v550_v19, %s770_s8 }
 0x92d   : > { %v554_v21 = vpop.permute.xlu0 %553 }
 0x92e   : > { %v556_v22 = vmul.f32 %v554_v21, %v539_v13 }
 0x930   : > { %v557_v16 = vpack.c.bf16 %v556_v22, %v556_v22  ;;  %559 = vrot.lane.b32.xlu1 %v556_v22, %s769_s7 }
 0x932   : > { %v565_v34 = vrot.slane %v557_v16, 3 }
 0x934   : > { %v569_v23 = vsel %vm566_vm6, %v557_v16, %v565_v34 }
 0x935   : > { %571 = vrot.lane.b32.xlu2 %v569_v23, %s769_s7  ;;  %v578_v24 = vpop.permute.xlu0 %577 }
 0x936   : > { %580 = vst.msk [vmem:[#allocation4] sm:$0x3] %vm562_vm7, %v578_v24 }
 0x98f   : > { %v572_v25 = vpop.permute.xlu2 %571 }
 0x990   : > { %575 = vst.msk [vmem:[#allocation3] sm:$0x1] %vm574_vm8, %v572_v25 }
 0x99e   : > { %584 = sbr.rel (%p668_p5) target bundleno = 2468 (0x9a4), region = 44 }
 0x9a2   : > { %v560_v26 = vpop.permute.xlu1 %559 }
 0x9a3   : > { %585 = vst.msk [vmem:[#allocation5] sm:$0x3] %vm562_vm7, %v560_v26 }
 0x9a4 PF: > { %p681_p6 = scmp.eq.s32.totalorder %s803_s16, 1  ;;  %s771_s9 = smov [#allocation5]  }
 0x9a5   : > { %s592_s10 = sshll.u32 %s771_s9, 4  ;;  %s594_s13 = sshll.u32 %s901_s4, 4  ;;  %s593_s10 = int_to_ptr.vmem [resolvable:$true] %s592_s10  ;;  %s595_s13 = int_to_ptr.hbm [resolvable:$true] %s594_s13 }
 0x9a6   : > { %678 = dma.vmem_to_hbm [thread:$0]  (%p681_p6), %s593_s10, 32, %s595_s13, [#allocation6]  }
 0x9a7   : > { %757 = dma.done.wait (%p681_p6), [#allocation6], 32  }
 0x9a8   : > { %759 = vsyncadd (%p681_p6), [#allocation6], 4294967264 }
 0x9a9 PF: > { %s15_s15 = sadd.s32 1, %s762_s15  }
 0x9aa   : > { %p12_p7 = scmp.ge.s32.totalorder %s15_s15, 4  }
 0x9ac   :  { %14 = sbr.rel (!%p12_p7) target bundleno = 1 (0x1), region = 74 }
 0x9b1   :  { %608 = vsyncpa [#allocation6], 1 }
 0x9b2   :  { %610 = vsyncpa [#allocation6 + $0x1], 1 }

</bundles_post_ra>
